<compile_context>
chip_gen: v7x
topology: tpu7x:2x2x1
jax: 0.10.0
libtpu: 0.0.40
codegen_flags: <defaults>
</compile_context>

<pallas_src>
import jax
import jax.numpy as jnp
from jax.experimental import pallas as pl
from jax.experimental.pallas import tpu as pltpu


def _round_up(n, m):
    return ((n + m - 1) // m) * m


def _padded_tile_bytes(rows, cols, itemsize):
    # VMEM footprint of a (rows, cols) tile under (8, 128) tiling.
    return _round_up(max(int(rows), 1), 8) * _round_up(max(int(cols), 1), 128) * itemsize


def _tpu_vmem_capacity_bytes(default=64 * 1024 * 1024):
    try:
        info = pltpu.get_tpu_info()
        cap = getattr(info, "vmem_capacity_bytes", None)
        if isinstance(cap, int) and cap > 0:
            return cap
    except Exception:
        pass
    return default


def _tpu_num_tensorcores(default=1):
    # Best-effort query; falls back to 1 (single-TC behavior) if unknown.
    try:
        info = pltpu.get_tpu_info()
        for name in ("num_cores", "core_count", "num_tensorcores",
                     "tensorcore_count", "cores_per_chip"):
            v = getattr(info, name, None)
            if isinstance(v, int) and v > 0:
                return v
    except Exception:
        pass
    return default


def _mlp_packed_kernel(x_ref, w1_ref, b1_ref, w2_ref, b2_ref, w3_ref, b3_ref,
                       w4_ref, b4_ref, o_ref):
    """Whole MLP for one batch tile; activations never leave VMEM.

    x_ref  : (T, k*J)   k samples packed per row
    w1..w3 : block-diagonal weights (k copies of the torch weight on the diag)
    w4_ref : (k*H, k)   per-group selector column = kron(eye(k), w4)
    o_ref  : (T, k)     one logit per packed sample (lane-dense output)
    """
    h = jnp.dot(x_ref[...], w1_ref[...], preferred_element_type=jnp.float32) + b1_ref[...]
    h = jnp.maximum(h, 0.0)
    h = jnp.dot(h.astype(w2_ref.dtype), w2_ref[...],
                preferred_element_type=jnp.float32) + b2_ref[...]
    h = jnp.maximum(h, 0.0)
    h = jnp.dot(h.astype(w3_ref.dtype), w3_ref[...],
                preferred_element_type=jnp.float32) + b3_ref[...]
    h = jnp.maximum(h, 0.0)
    o = jnp.dot(h.astype(w4_ref.dtype), w4_ref[...],
                preferred_element_type=jnp.float32) + b4_ref[...]
    o_ref[...] = o.astype(o_ref.dtype)


# largest packing factor tried first; k*J must stay modest (k<=12 -> 120 lanes for J=10)
_PACK_CANDIDATES = tuple(range(12, 0, -1))


def discriminator_forward(x, params, *, pack=None, tile_rows=None,
                          target_x_tile_bytes=2 * 1024 * 1024):
    """Forward pass of the Discriminator MLP.

    x      : (B, J) float32 (exact torch semantics) or bfloat16 (faster x read;
             MXU still accumulates in f32, bias/ReLU stay f32).
    params : dict with w1(J,H) b1(1,H) w2(H,H) b2(1,H) w3(H,H) b3(1,H) w4(H,1) b4(1,1),
             weights stored as (in_features, out_features) so y = x @ W + b.
    """
    B, J = x.shape
    H = params["w1"].shape[1]
    compute_dtype = x.dtype

    # ---- sample packing: k samples per row via a free row-major reshape -------
    if pack is None:
        pack = next(k for k in _PACK_CANDIDATES if B % k == 0)
    k = int(pack)
    assert B % k == 0, "pack factor must divide the batch"
    R = B // k                      # packed rows
    kJ, kH = k * J, k * H
    xp = x.reshape(R, kJ)           # bitcast, no HBM copy

    # Block-diagonal weights (built once, tiny, resident in VMEM across the grid).
    eye = jnp.eye(k, dtype=compute_dtype)
    w1 = jnp.kron(eye, params["w1"].astype(compute_dtype))                 # (kJ, kH)
    w2 = jnp.kron(eye, params["w2"].astype(compute_dtype))                 # (kH, kH)
    w3 = jnp.kron(eye, params["w3"].astype(compute_dtype))                 # (kH, kH)
    w4 = jnp.kron(eye, params["w4"].reshape(H, 1).astype(compute_dtype))   # (kH, k)
    b1 = jnp.tile(params["b1"].reshape(1, H).astype(jnp.float32), (1, k))  # (1, kH)
    b2 = jnp.tile(params["b2"].reshape(1, H).astype(jnp.float32), (1, k))
    b3 = jnp.tile(params["b3"].reshape(1, H).astype(jnp.float32), (1, k))
    b4 = params["b4"].reshape(1, 1).astype(jnp.float32)                    # (1, 1)

    # ---- batch tile: big enough per step to amortize the ~0.35us grid overhead --
    itemsize = jnp.dtype(compute_dtype).itemsize
    row_bytes = kJ * itemsize
    if tile_rows is None:
        tile_rows = max(8, (target_x_tile_bytes // row_bytes) // 8 * 8)
    tile_rows = max(8, (min(int(tile_rows), R) // 8) * 8)
    num_tiles = -(-R // tile_rows)

    # On a 2-TensorCore part (v7x) make sure the "parallel" axis has >= 2 steps
    # so megacore sharding can kick in; single-TC chips keep one big step.
    if num_tiles == 1 and R >= 1024 and _tpu_num_tensorcores() >= 2:
        tile_rows = max(8, (-(-R // 2) // 8) * 8)
        num_tiles = -(-R // tile_rows)

    # ---- computed VMEM budget, capped by queried per-core capacity -------------
    need = (
        2 * _padded_tile_bytes(tile_rows, kJ, itemsize)      # x tile, double-buffered
        + 2 * _padded_tile_bytes(tile_rows, k, 4)            # out tile, double-buffered
        + 3 * _padded_tile_bytes(tile_rows, kH, 4)           # live f32 activations
        + 2 * (_padded_tile_bytes(kJ, kH, itemsize)          # resident weights (dbl-buf alloc)
               + 2 * _padded_tile_bytes(kH, kH, itemsize)
               + _padded_tile_bytes(kH, k, itemsize)
               + 4 * _padded_tile_bytes(1, kH, 4))
    )
    cap = max(32 * 1024 * 1024, int(0.85 * _tpu_vmem_capacity_bytes()))
    vmem_limit = min(max(int(need * 1.4) + 4 * 1024 * 1024, 32 * 1024 * 1024), cap)

    out_packed = pl.pallas_call(
        _mlp_packed_kernel,
        out_shape=jax.ShapeDtypeStruct((R, k), jnp.float32),
        grid=(num_tiles,),
        in_specs=[
            pl.BlockSpec((tile_rows, kJ), lambda i: (i, 0)),   # x tile
            pl.BlockSpec((kJ, kH), lambda i: (0, 0)),          # w1 (resident)
            pl.BlockSpec((1, kH), lambda i: (0, 0)),           # b1
            pl.BlockSpec((kH, kH), lambda i: (0, 0)),          # w2
            pl.BlockSpec((1, kH), lambda i: (0, 0)),           # b2
            pl.BlockSpec((kH, kH), lambda i: (0, 0)),          # w3
            pl.BlockSpec((1, kH), lambda i: (0, 0)),           # b3
            pl.BlockSpec((kH, k), lambda i: (0, 0)),           # w4 selector
            pl.BlockSpec((1, 1), lambda i: (0, 0)),            # b4
        ],
        out_specs=pl.BlockSpec((tile_rows, k), lambda i: (i, 0)),
        compiler_params=pltpu.CompilerParams(
            dimension_semantics=("parallel",),
            vmem_limit_bytes=vmem_limit),
    )(xp, w1, b1, w2, b2, w3, b3, w4, b4)

    # (R, k) -> (B, 1) is a row-major-compatible reshape: no copy, correct order.
    return out_packed.reshape(B, 1)


def init_params(key, J=10, H=20):
    """Deterministic synthetic init (uniform, like torch's default fan-in bound)."""
    ks = jax.random.split(key, 8)

    def lin(kw, kb, fan_in, fan_out):
        bound = 1.0 / jnp.sqrt(jnp.float32(fan_in))
        w = jax.random.uniform(kw, (fan_in, fan_out), jnp.float32, -bound, bound)
        b = jax.random.uniform(kb, (1, fan_out), jnp.float32, -bound, bound)
        return w, b

    w1, b1 = lin(ks[0], ks[1], J, H)
    w2, b2 = lin(ks[2], ks[3], H, H)
    w3, b3 = lin(ks[4], ks[5], H, H)
    w4, b4 = lin(ks[6], ks[7], H, 1)
    return dict(w1=w1, b1=b1, w2=w2, b2=b2, w3=w3, b3=b3, w4=w4, b4=b4)


def _reference_forward(x, p):
    h = jnp.maximum(x @ p["w1"] + p["b1"], 0.0)
    h = jnp.maximum(h @ p["w2"] + p["b2"], 0.0)
    h = jnp.maximum(h @ p["w3"] + p["b3"], 0.0)
    return h @ p["w4"] + p["b4"]


if __name__ == "__main__":
    J, H = 10, 20
    key = jax.random.PRNGKey(0)
    k_x1, k_x2, k_x3, k_p = jax.random.split(key, 4)
    params = init_params(k_p, J=J, H=H)

    fwd = jax.jit(lambda x, p: discriminator_forward(x, p))
    fwd_small_tiles = jax.jit(lambda x, p: discriminator_forward(x, p, tile_rows=32))

    # 1) B=96 -> pack k=12 (120 of 128 input lanes), single full block, f32.
    B1 = 96
    x1 = jax.random.normal(k_x1, (B1, J), dtype=jnp.float32)
    out1 = jax.block_until_ready(fwd(x1, params))
    ref1 = _reference_forward(x1, params)
    assert out1.shape == (B1, 1)
    assert jnp.allclose(out1, ref1, atol=1e-5, rtol=1e-5)

    # 2) B=1000 -> pack k=8, forced small tile: multi-step grid + partial last block.
    B2 = 1000
    x2 = jax.random.normal(k_x2, (B2, J), dtype=jnp.float32)
    out2 = jax.block_until_ready(fwd_small_tiles(x2, params))
    ref2 = _reference_forward(x2, params)
    assert out2.shape == (B2, 1)
    assert jnp.allclose(out2, ref2, atol=1e-5, rtol=1e-5)

    # 3) B=13 (prime > 12) -> packing factor falls back to k=1, still no padding.
    B3 = 13
    x3 = jax.random.normal(k_x3, (B3, J), dtype=jnp.float32)
    out3 = jax.block_until_ready(fwd(x3, params))
    ref3 = _reference_forward(x3, params)
    assert out3.shape == (B3, 1)
    assert jnp.allclose(out3, ref3, atol=1e-5, rtol=1e-5)

    # 4) bf16 activations supplied by the caller (no extra convert pass over x).
    out4 = jax.block_until_ready(fwd(x2.astype(jnp.bfloat16), params))
    assert out4.shape == (B2, 1)
    assert jnp.allclose(out4, ref2, atol=1e-1, rtol=1e-1)

    print("KERNEL_OK")
</pallas_src>

<mosaic_0001>
module attributes {stable_mosaic.version = 11 : i64} {
  func.func @_mlp_packed_kernel(%arg0: i32, %arg1: memref<8x120xf32, #tpu.memory_space<vmem>>, %arg2: memref<120x240xf32, #tpu.memory_space<vmem>>, %arg3: memref<1x240xf32, #tpu.memory_space<vmem>>, %arg4: memref<240x240xf32, #tpu.memory_space<vmem>>, %arg5: memref<1x240xf32, #tpu.memory_space<vmem>>, %arg6: memref<240x240xf32, #tpu.memory_space<vmem>>, %arg7: memref<1x240xf32, #tpu.memory_space<vmem>>, %arg8: memref<240x12xf32, #tpu.memory_space<vmem>>, %arg9: memref<1x1xf32, #tpu.memory_space<vmem>>, %arg10: memref<8x12xf32, #tpu.memory_space<vmem>>) attributes {dimension_semantics = [#tpu.dimension_semantics<parallel>], iteration_bounds = array<i64: 1>, scalar_prefetch = 0 : i64, scratch_operands = 0 : i64, tpu.core_type = #tpu.core_type<tc>, window_params = [{transform_indices = @transform_0, window_bounds = array<i64: 8, 120>}, {pipeline_mode = #tpu.pipeline_mode<synchronous>, transform_indices = @transform_1, window_bounds = array<i64: 120, 240>}, {pipeline_mode = #tpu.pipeline_mode<synchronous>, transform_indices = @transform_2, window_bounds = array<i64: 1, 240>}, {pipeline_mode = #tpu.pipeline_mode<synchronous>, transform_indices = @transform_3, window_bounds = array<i64: 240, 240>}, {pipeline_mode = #tpu.pipeline_mode<synchronous>, transform_indices = @transform_4, window_bounds = array<i64: 1, 240>}, {pipeline_mode = #tpu.pipeline_mode<synchronous>, transform_indices = @transform_5, window_bounds = array<i64: 240, 240>}, {pipeline_mode = #tpu.pipeline_mode<synchronous>, transform_indices = @transform_6, window_bounds = array<i64: 1, 240>}, {pipeline_mode = #tpu.pipeline_mode<synchronous>, transform_indices = @transform_7, window_bounds = array<i64: 240, 12>}, {pipeline_mode = #tpu.pipeline_mode<synchronous>, transform_indices = @transform_8, window_bounds = array<i64: 1, 1>}, {transform_indices = @transform_9, window_bounds = array<i64: 8, 12>}]} {
    %c0 = arith.constant 0 : index
    %c0_0 = arith.constant 0 : index
    %0 = vector.load %arg1[%c0, %c0_0] : memref<8x120xf32, #tpu.memory_space<vmem>>, vector<8x120xf32>
    %c0_1 = arith.constant 0 : index
    %c0_2 = arith.constant 0 : index
    %1 = vector.load %arg2[%c0_1, %c0_2] : memref<120x240xf32, #tpu.memory_space<vmem>>, vector<120x240xf32>
    %cst = arith.constant dense<0.000000e+00> : vector<8x240xf32>
    %2 = tpu.matmul %0, %1, %cst {dimension_numbers = #tpu.dot_dimension_numbers<[1], [0], [0], [1], [0, 0, 1, 1], [], []>} : vector<8x120xf32>, vector<120x240xf32>, vector<8x240xf32> -> vector<8x240xf32>
    %c0_3 = arith.constant 0 : index
    %c0_4 = arith.constant 0 : index
    %3 = vector.load %arg3[%c0_3, %c0_4] : memref<1x240xf32, #tpu.memory_space<vmem>>, vector<1x240xf32>
    %4 = vector.broadcast %3 : vector<1x240xf32> to vector<8x240xf32>
    %5 = arith.addf %2, %4 : vector<8x240xf32>
    %cst_5 = arith.constant 0.000000e+00 : f32
    %6 = vector.broadcast %cst_5 : f32 to vector<8x240xf32>
    %7 = arith.maximumf %5, %6 : vector<8x240xf32>
    %c0_6 = arith.constant 0 : index
    %c0_7 = arith.constant 0 : index
    %8 = vector.load %arg4[%c0_6, %c0_7] : memref<240x240xf32, #tpu.memory_space<vmem>>, vector<240x240xf32>
    %cst_8 = arith.constant dense<0.000000e+00> : vector<8x240xf32>
    %9 = tpu.matmul %7, %8, %cst_8 {dimension_numbers = #tpu.dot_dimension_numbers<[1], [0], [0], [1], [0, 0, 1, 1], [], []>} : vector<8x240xf32>, vector<240x240xf32>, vector<8x240xf32> -> vector<8x240xf32>
    %c0_9 = arith.constant 0 : index
    %c0_10 = arith.constant 0 : index
    %10 = vector.load %arg5[%c0_9, %c0_10] : memref<1x240xf32, #tpu.memory_space<vmem>>, vector<1x240xf32>
    %11 = vector.broadcast %10 : vector<1x240xf32> to vector<8x240xf32>
    %12 = arith.addf %9, %11 : vector<8x240xf32>
    %cst_11 = arith.constant 0.000000e+00 : f32
    %13 = vector.broadcast %cst_11 : f32 to vector<8x240xf32>
    %14 = arith.maximumf %12, %13 : vector<8x240xf32>
    %c0_12 = arith.constant 0 : index
    %c0_13 = arith.constant 0 : index
    %15 = vector.load %arg6[%c0_12, %c0_13] : memref<240x240xf32, #tpu.memory_space<vmem>>, vector<240x240xf32>
    %cst_14 = arith.constant dense<0.000000e+00> : vector<8x240xf32>
    %16 = tpu.matmul %14, %15, %cst_14 {dimension_numbers = #tpu.dot_dimension_numbers<[1], [0], [0], [1], [0, 0, 1, 1], [], []>} : vector<8x240xf32>, vector<240x240xf32>, vector<8x240xf32> -> vector<8x240xf32>
    %c0_15 = arith.constant 0 : index
    %c0_16 = arith.constant 0 : index
    %17 = vector.load %arg7[%c0_15, %c0_16] : memref<1x240xf32, #tpu.memory_space<vmem>>, vector<1x240xf32>
    %18 = vector.broadcast %17 : vector<1x240xf32> to vector<8x240xf32>
    %19 = arith.addf %16, %18 : vector<8x240xf32>
    %cst_17 = arith.constant 0.000000e+00 : f32
    %20 = vector.broadcast %cst_17 : f32 to vector<8x240xf32>
    %21 = arith.maximumf %19, %20 : vector<8x240xf32>
    %c0_18 = arith.constant 0 : index
    %c0_19 = arith.constant 0 : index
    %22 = vector.load %arg8[%c0_18, %c0_19] : memref<240x12xf32, #tpu.memory_space<vmem>>, vector<240x12xf32>
    %cst_20 = arith.constant dense<0.000000e+00> : vector<8x12xf32>
    %23 = tpu.matmul %21, %22, %cst_20 {dimension_numbers = #tpu.dot_dimension_numbers<[1], [0], [0], [1], [0, 0, 1, 1], [], []>} : vector<8x240xf32>, vector<240x12xf32>, vector<8x12xf32> -> vector<8x12xf32>
    %c0_21 = arith.constant 0 : index
    %c0_22 = arith.constant 0 : index
    %24 = vector.load %arg9[%c0_21, %c0_22] : memref<1x1xf32, #tpu.memory_space<vmem>>, vector<1x1xf32>
    %25 = vector.broadcast %24 : vector<1x1xf32> to vector<8x12xf32>
    %26 = arith.addf %23, %25 : vector<8x12xf32>
    %c0_23 = arith.constant 0 : index
    %c0_24 = arith.constant 0 : index
    %27 = vector.load %arg10[%c0_23, %c0_24] : memref<8x12xf32, #tpu.memory_space<vmem>>, vector<8x12xf32>
    tpu.vector_store %arg10[%c0_23, %c0_24], %26 {strides = array<i32>} : memref<8x12xf32, #tpu.memory_space<vmem>>, vector<8x12xf32>,
    return
  }
  func.func @transform_0(%arg0: i32) -> (i32, i32) {
    %c0_i32 = arith.constant 0 : i32
    %c0_i32_0 = arith.constant 0 : i32
    return %arg0, %c0_i32 : i32, i32
  }
  func.func @transform_1(%arg0: i32) -> (i32, i32) {
    %c0_i32 = arith.constant 0 : i32
    %c0_i32_0 = arith.constant 0 : i32
    %c0_i32_1 = arith.constant 0 : i32
    return %c0_i32, %c0_i32_0 : i32, i32
  }
  func.func @transform_2(%arg0: i32) -> (i32, i32) {
    %c0_i32 = arith.constant 0 : i32
    %c0_i32_0 = arith.constant 0 : i32
    %c0_i32_1 = arith.constant 0 : i32
    return %c0_i32, %c0_i32_0 : i32, i32
  }
  func.func @transform_3(%arg0: i32) -> (i32, i32) {
    %c0_i32 = arith.constant 0 : i32
    %c0_i32_0 = arith.constant 0 : i32
    %c0_i32_1 = arith.constant 0 : i32
    return %c0_i32, %c0_i32_0 : i32, i32
  }
  func.func @transform_4(%arg0: i32) -> (i32, i32) {
    %c0_i32 = arith.constant 0 : i32
    %c0_i32_0 = arith.constant 0 : i32
    %c0_i32_1 = arith.constant 0 : i32
    return %c0_i32, %c0_i32_0 : i32, i32
  }
  func.func @transform_5(%arg0: i32) -> (i32, i32) {
    %c0_i32 = arith.constant 0 : i32
    %c0_i32_0 = arith.constant 0 : i32
    %c0_i32_1 = arith.constant 0 : i32
    return %c0_i32, %c0_i32_0 : i32, i32
  }
  func.func @transform_6(%arg0: i32) -> (i32, i32) {
    %c0_i32 = arith.constant 0 : i32
    %c0_i32_0 = arith.constant 0 : i32
    %c0_i32_1 = arith.constant 0 : i32
    return %c0_i32, %c0_i32_0 : i32, i32
  }
  func.func @transform_7(%arg0: i32) -> (i32, i32) {
    %c0_i32 = arith.constant 0 : i32
    %c0_i32_0 = arith.constant 0 : i32
    %c0_i32_1 = arith.constant 0 : i32
    return %c0_i32, %c0_i32_0 : i32, i32
  }
  func.func @transform_8(%arg0: i32) -> (i32, i32) {
    %c0_i32 = arith.constant 0 : i32
    %c0_i32_0 = arith.constant 0 : i32
    %c0_i32_1 = arith.constant 0 : i32
    return %c0_i32, %c0_i32_0 : i32, i32
  }
  func.func @transform_9(%arg0: i32) -> (i32, i32) {
    %c0_i32 = arith.constant 0 : i32
    %c0_i32_0 = arith.constant 0 : i32
    return %arg0, %c0_i32 : i32, i32
  }
}

</mosaic_0001>

<bundles_post_ra>
// kernel: _lambda_.1
= control target key start
LH: loop header
LB: loop body
LE: loop exit
PB: predicated region body
PF: predicated region fallthrough
CT: control target
= control target key end

     0   :  { %v772_v3 = vmov 0.0   ;;  %vm77_vm0 = vcmask 982016   ;;  %vm226_vm1 = vcmask 916480   ;;  %vm564_vm2 = vcmask 97280   ;;  %s1411_s1 = inlined_call_operand.vmem [shape: f32[120,240], index: 1, kind: input, shape index: {}]   ;;  %s1412_s3 = inlined_call_operand.vmem [shape: f32[240,240], index: 3, kind: input, shape index: {}]   ;;  %s1413_s0 = inlined_call_operand.vmem [shape: f32[8,120], index: 0, kind: input, shape index: {}]   ;;  %s1414_s5 = inlined_call_operand.vmem [shape: f32[240,240], index: 5, kind: input, shape index: {}]   ;;  %s1415_s2 = inlined_call_operand.vmem [shape: f32[1,240], index: 2, kind: input, shape index: {}]   ;;  %s1416_s7 = inlined_call_operand.vmem [shape: f32[240,12], index: 7, kind: input, shape index: {}]   ;;  %s1417_s4 = inlined_call_operand.vmem [shape: f32[1,240], index: 4, kind: input, shape index: {}]   ;;  %s1418_s8 = inlined_call_operand.<no memory space> [shape: f32[1,1], index: 8, kind: input, shape index: {}]   ;;  %s1419_s6 = inlined_call_operand.vmem [shape: f32[1,240], index: 6, kind: input, shape index: {}]   ;;  %s1420_s9 = inlined_call_operand.vmem [shape: f32[8,12], index: 9, kind: output, shape index: {}]  }
   0x1   :  { %v36_v0 = vld [vmem:[%s1411_s1 + $0x8] sm:$0xff]  ;;  %v38_v1 = vld [vmem:[%s1411_s1 + $0x18] sm:$0xff]  ;;  %v35_v2 = vld [vmem:[%s1411_s1] sm:$0xff]  ;;  %145 = vmatprep.mubr.f32.mxu0 %v772_v3 }
   0x2   :  { %v575_v4 = vpack.c.bf16 %v38_v1, %v36_v0  ;;  %v37_v5 = vld [vmem:[%s1411_s1 + $0x10] sm:$0xff]  ;;  %v40_v6 = vld [vmem:[%s1411_s1 + $0x28] sm:$0xff]  ;;  %v42_v7 = vld [vmem:[%s1411_s1 + $0x38] sm:$0xff] }
   0x3   :  { %v577_v8 = vpack.c.bf16 %v37_v5, %v35_v2  ;;  %v579_v9 = vpack.c.bf16 %v42_v7, %v40_v6  ;;  %v39_v10 = vld [vmem:[%s1411_s1 + $0x20] sm:$0xff]  ;;  %v41_v11 = vld [vmem:[%s1411_s1 + $0x30] sm:$0xff]  ;;  %v44_v12 = vld [vmem:[%s1411_s1 + $0x48] sm:$0xff] }
   0x4   :  { %576 = vmatprep.subr.bf16.mxu0 %v575_v4  ;;  %v46_v13 = vld [vmem:[%s1411_s1 + $0x58] sm:$0xff]  ;;  %v581_v14 = vpack.c.bf16 %v41_v11, %v39_v10  ;;  %v43_v16 = vld [vmem:[%s1411_s1 + $0x40] sm:$0xff]  ;;  %v45_v17 = vld [vmem:[%s1411_s1 + $0x50] sm:$0xff] }
   0x5   :  { %578 = vmatpush1.bf16.msra.mxu0 %v577_v8  ;;  %v583_v15 = vpack.c.bf16 %v46_v13, %v44_v12  ;;  %v48_v18 = vld [vmem:[%s1411_s1 + $0x68] sm:$0xff]  ;;  %v50_v19 = vld [vmem:[%s1411_s1 + $0x78] sm:$0xff]  ;;  %v585_v20 = vpack.c.bf16 %v45_v17, %v43_v16  ;;  %v47_v22 = vld [vmem:[%s1411_s1 + $0x60] sm:$0xff] }
   0x6   :  { %580 = vmatprep.subr.bf16.mxu0 %v579_v9  ;;  %v587_v21 = vpack.c.bf16 %v50_v19, %v48_v18  ;;  %v49_v23 = vld [vmem:[%s1411_s1 + $0x70] sm:$0xff]  ;;  %v52_v24 = vld [vmem:[%s1411_s1 + $0x88] sm:$0xff]  ;;  %v54_v25 = vld [vmem:[%s1411_s1 + $0x98] sm:$0xff] }
   0x7   :  { %v155_v26 = vld [vmem:[%s1412_s3 + $0x8] sm:$0xff]  ;;  %v157_v27 = vld [vmem:[%s1412_s3 + $0x18] sm:$0xff]  ;;  %v51_v28 = vld [vmem:[%s1411_s1 + $0x80] sm:$0xff]  ;;  %v589_v33 = vpack.c.bf16 %v49_v23, %v47_v22  ;;  %v591_v38 = vpack.c.bf16 %v54_v25, %v52_v24 }
   0x8   :  { %v603_v29 = vpack.c.bf16 %v157_v27, %v155_v26  ;;  %v154_v30 = vld [vmem:[%s1412_s3] sm:$0xff]  ;;  %v156_v31 = vld [vmem:[%s1412_s3 + $0x10] sm:$0xff]  ;;  %v159_v32 = vld [vmem:[%s1412_s3 + $0x28] sm:$0xff] }
   0x9   :  { %582 = vmatpush1.bf16.msra.mxu0 %v581_v14  ;;  %v605_v34 = vpack.c.bf16 %v156_v31, %v154_v30  ;;  %v161_v35 = vld [vmem:[%s1412_s3 + $0x38] sm:$0xff]  ;;  %v158_v36 = vld [vmem:[%s1412_s3 + $0x20] sm:$0xff]  ;;  %v160_v37 = vld [vmem:[%s1412_s3 + $0x30] sm:$0xff] }
   0xa   :  { %584 = vmatprep.subr.bf16.mxu0 %v583_v15  ;;  %v53_v39 = vld [vmem:[%s1411_s1 + $0x90] sm:$0xff]  ;;  %604 = vmatprep.subr.bf16.mxu1 %v603_v29  ;;  %v607_v40 = vpack.c.bf16 %v161_v35, %v159_v32  ;;  %v163_v41 = vld [vmem:[%s1412_s3 + $0x48] sm:$0xff]  ;;  %v165_v42 = vld [vmem:[%s1412_s3 + $0x58] sm:$0xff]  ;;  %v609_v45 = vpack.c.bf16 %v160_v37, %v158_v36 }
   0xb   :  { %v56_v43 = vld [vmem:[%s1411_s1 + $0xa8] sm:$0xff]  ;;  %v58_v44 = vld [vmem:[%s1411_s1 + $0xb8] sm:$0xff]  ;;  %606 = vmatpush1.bf16.msra.mxu1 %v605_v34  ;;  %v611_v46 = vpack.c.bf16 %v165_v42, %v163_v41  ;;  %v162_v47 = vld [vmem:[%s1412_s3 + $0x40] sm:$0xff]  ;;  %v593_v49 = vpack.c.bf16 %v53_v39, %v51_v28 }
   0xc   :  { %608 = vmatprep.subr.bf16.mxu1 %v607_v40  ;;  %v164_v48 = vld [vmem:[%s1412_s3 + $0x50] sm:$0xff]  ;;  %v167_v50 = vld [vmem:[%s1412_s3 + $0x68] sm:$0xff]  ;;  %v169_v51 = vld [vmem:[%s1412_s3 + $0x78] sm:$0xff]  ;;  %v595_v52 = vpack.c.bf16 %v58_v44, %v56_v43 }
   0xd   :  { %586 = vmatpush1.bf16.msra.mxu0 %v585_v20  ;;  %v55_v53 = vld [vmem:[%s1411_s1 + $0xa0] sm:$0xff]  ;;  %v57_v54 = vld [vmem:[%s1411_s1 + $0xb0] sm:$0xff]  ;;  %v60_v55 = vld [vmem:[%s1411_s1 + $0xc8] sm:$0xff]  ;;  %v613_v57 = vpack.c.bf16 %v164_v48, %v162_v47  ;;  %v615_v58 = vpack.c.bf16 %v169_v51, %v167_v50 }
   0xe   :  { %588 = vmatprep.subr.bf16.mxu0 %v587_v21  ;;  %v62_v56 = vld [vmem:[%s1411_s1 + $0xd8] sm:$0xff]  ;;  %v166_v59 = vld [vmem:[%s1412_s3 + $0x60] sm:$0xff]  ;;  %v168_v60 = vld [vmem:[%s1412_s3 + $0x70] sm:$0xff]  ;;  %v597_v61 = vpack.c.bf16 %v57_v54, %v55_v53 }
   0xf   :  { %610 = vmatpush1.bf16.msra.mxu1 %v609_v45  ;;  %v171_v62 = vld [vmem:[%s1412_s3 + $0x88] sm:$0xff]  ;;  %v173_v63 = vld [vmem:[%s1412_s3 + $0x98] sm:$0xff]  ;;  %v599_v0 = vpack.c.bf16 %v62_v56, %v60_v55  ;;  %v59_v1 = vld [vmem:[%s1411_s1 + $0xc0] sm:$0xff]  ;;  %v617_v3 = vpack.c.bf16 %v168_v60, %v166_v59 }
  0x10   :  { %612 = vmatprep.subr.bf16.mxu1 %v611_v46  ;;  %v61_v2 = vld [vmem:[%s1411_s1 + $0xd0] sm:$0xff]  ;;  %v619_v4 = vpack.c.bf16 %v173_v63, %v171_v62  ;;  %v170_v5 = vld [vmem:[%s1412_s3 + $0x80] sm:$0xff]  ;;  %v175_v8 = vld [vmem:[%s1412_s3 + $0xa8] sm:$0xff] }
  0x11   :  { %590 = vmatpush1.bf16.msra.mxu0 %v589_v33  ;;  %v172_v6 = vld [vmem:[%s1412_s3 + $0x90] sm:$0xff]  ;;  %v601_v7 = vpack.c.bf16 %v61_v2, %v59_v1  ;;  %v177_v9 = vld [vmem:[%s1412_s3 + $0xb8] sm:$0xff]  ;;  %v64_v10 = vld [vmem:[%s1411_s1 + $0xe8] sm:$0xff] }
  0x12   :  { %592 = vmatprep.subr.bf16.mxu0 %v591_v38  ;;  %v621_v11 = vpack.c.bf16 %v172_v6, %v170_v5  ;;  %v623_v12 = vpack.c.bf16 %v177_v9, %v175_v8  ;;  %v174_v13 = vld [vmem:[%s1412_s3 + $0xa0] sm:$0xff]  ;;  %v176_v14 = vld [vmem:[%s1412_s3 + $0xb0] sm:$0xff]  ;;  %v179_v15 = vld [vmem:[%s1412_s3 + $0xc8] sm:$0xff] }
  0x13   :  { %614 = vmatpush1.bf16.msra.mxu1 %v613_v57  ;;  %v181_v16 = vld [vmem:[%s1412_s3 + $0xd8] sm:$0xff]  ;;  %v63_v17 = vld [vmem:[%s1411_s1 + $0xe0] sm:$0xff]  ;;  %v625_v19 = vpack.c.bf16 %v176_v14, %v174_v13  ;;  %v180_v22 = vld [vmem:[%s1412_s3 + $0xd0] sm:$0xff] }
  0x14   :  { %616 = vmatprep.subr.bf16.mxu1 %v615_v58  ;;  %v34_v18 = vld [vmem:[%s1413_s0] sm:$0xff]  ;;  %v627_v20 = vpack.c.bf16 %v181_v16, %v179_v15  ;;  %v183_v23 = vld [vmem:[%s1412_s3 + $0xe8] sm:$0xff]  ;;  %v185_v24 = vld [vmem:[%s1412_s3 + $0xf8] sm:$0xff] }
  0x15   :  { %594 = vmatpush1.bf16.msra.mxu0 %v593_v49  ;;  %v178_v21 = vld [vmem:[%s1412_s3 + $0xc0] sm:$0xff]  ;;  %v631_v26 = vpack.c.bf16 %v185_v24, %v183_v23  ;;  %v184_v28 = vld [vmem:[%s1412_s3 + $0xf0] sm:$0xff]  ;;  %v187_v29 = vld [vmem:[%s1412_s3 + $0x108] sm:$0xff] }
  0x16   :  { %596 = vmatprep.subr.bf16.mxu0 %v595_v52  ;;  %v629_v25 = vpack.c.bf16 %v180_v22, %v178_v21  ;;  %v182_v27 = vld [vmem:[%s1412_s3 + $0xe0] sm:$0xff]  ;;  %v189_v30 = vld [vmem:[%s1412_s3 + $0x118] sm:$0xff]  ;;  %v188_v34 = vld [vmem:[%s1412_s3 + $0x110] sm:$0xff] }
  0x17   :  { %618 = vmatpush1.bf16.msra.mxu1 %v617_v3  ;;  %v633_v31 = vpack.c.bf16 %v184_v28, %v182_v27  ;;  %v635_v32 = vpack.c.bf16 %v189_v30, %v187_v29  ;;  %v186_v33 = vld [vmem:[%s1412_s3 + $0x100] sm:$0xff]  ;;  %v191_v35 = vld [vmem:[%s1412_s3 + $0x128] sm:$0xff]  ;;  %v193_v36 = vld [vmem:[%s1412_s3 + $0x138] sm:$0xff] }
  0x18   :  { %620 = vmatprep.subr.bf16.mxu1 %v619_v4  ;;  %v637_v37 = vpack.c.bf16 %v188_v34, %v186_v33  ;;  %v639_v38 = vpack.c.bf16 %v193_v36, %v191_v35  ;;  %v190_v39 = vld [vmem:[%s1412_s3 + $0x120] sm:$0xff]  ;;  %v192_v40 = vld [vmem:[%s1412_s3 + $0x130] sm:$0xff]  ;;  %v195_v41 = vld [vmem:[%s1412_s3 + $0x148] sm:$0xff] }
  0x19   :  { %598 = vmatpush1.bf16.msra.mxu0 %v597_v61  ;;  %v197_v42 = vld [vmem:[%s1412_s3 + $0x158] sm:$0xff]  ;;  %v641_v43 = vpack.c.bf16 %v192_v40, %v190_v39  ;;  %v194_v45 = vld [vmem:[%s1412_s3 + $0x140] sm:$0xff]  ;;  %v196_v46 = vld [vmem:[%s1412_s3 + $0x150] sm:$0xff] }
  0x1a   :  { %600 = vmatprep.subr.bf16.mxu0 %v599_v0  ;;  %v643_v44 = vpack.c.bf16 %v197_v42, %v195_v41  ;;  %v199_v47 = vld [vmem:[%s1412_s3 + $0x168] sm:$0xff]  ;;  %v201_v48 = vld [vmem:[%s1412_s3 + $0x178] sm:$0xff]  ;;  %v645_v49 = vpack.c.bf16 %v196_v46, %v194_v45  ;;  %v198_v51 = vld [vmem:[%s1412_s3 + $0x160] sm:$0xff] }
  0x1b   :  { %622 = vmatpush1.bf16.msra.mxu1 %v621_v11  ;;  %v647_v50 = vpack.c.bf16 %v201_v48, %v199_v47  ;;  %v200_v52 = vld [vmem:[%s1412_s3 + $0x170] sm:$0xff]  ;;  %v203_v53 = vld [vmem:[%s1412_s3 + $0x188] sm:$0xff]  ;;  %v205_v54 = vld [vmem:[%s1412_s3 + $0x198] sm:$0xff] }
  0x1c   :  { %624 = vmatprep.subr.bf16.mxu1 %v623_v12  ;;  %v649_v55 = vpack.c.bf16 %v200_v52, %v198_v51  ;;  %v651_v56 = vpack.c.bf16 %v205_v54, %v203_v53  ;;  %v202_v57 = vld [vmem:[%s1412_s3 + $0x180] sm:$0xff]  ;;  %v204_v58 = vld [vmem:[%s1412_s3 + $0x190] sm:$0xff]  ;;  %v207_v59 = vld [vmem:[%s1412_s3 + $0x1a8] sm:$0xff] }
  0x1d   :  { %602 = vmatpush1.bf16.msra.mxu0 %v601_v7  ;;  %v209_v60 = vld [vmem:[%s1412_s3 + $0x1b8] sm:$0xff]  ;;  %v653_v61 = vpack.c.bf16 %v204_v58, %v202_v57  ;;  %v206_v63 = vld [vmem:[%s1412_s3 + $0x1a0] sm:$0xff]  ;;  %v208_v0 = vld [vmem:[%s1412_s3 + $0x1b0] sm:$0xff] }
  0x1e   :  { %109 = vmatprep.subr.mxu0 %v64_v10  ;;  %v655_v62 = vpack.c.bf16 %v209_v60, %v207_v59  ;;  %v657_v1 = vpack.c.bf16 %v208_v0, %v206_v63  ;;  %v211_v2 = vld [vmem:[%s1412_s3 + $0x1c8] sm:$0xff]  ;;  %v213_v3 = vld [vmem:[%s1412_s3 + $0x1d8] sm:$0xff]  ;;  %v210_v5 = vld [vmem:[%s1412_s3 + $0x1c0] sm:$0xff] }
  0x1f   :  { %626 = vmatpush1.bf16.msra.mxu1 %v625_v19  ;;  %v659_v4 = vpack.c.bf16 %v213_v3, %v211_v2  ;;  %v212_v6 = vld [vmem:[%s1412_s3 + $0x1d0] sm:$0xff]  ;;  %v304_v8 = vld [vmem:[%s1414_s5 + $0x8] sm:$0xff]  ;;  %v306_v9 = vld [vmem:[%s1414_s5 + $0x18] sm:$0xff] }
  0x20   :  { %628 = vmatprep.subr.bf16.mxu1 %v627_v20  ;;  %v661_v7 = vpack.c.bf16 %v212_v6, %v210_v5  ;;  %v303_v10 = vld [vmem:[%s1414_s5] sm:$0xff]  ;;  %v663_v11 = vpack.c.bf16 %v306_v9, %v304_v8  ;;  %v305_v12 = vld [vmem:[%s1414_s5 + $0x10] sm:$0xff]  ;;  %v308_v13 = vld [vmem:[%s1414_s5 + $0x28] sm:$0xff] }
  0x21   :  { %110 = vmatpush1.msra.mxu0 %v63_v17  ;;  %v310_v14 = vld [vmem:[%s1414_s5 + $0x38] sm:$0xff]  ;;  %v665_v15 = vpack.c.bf16 %v305_v12, %v303_v10  ;;  %v307_v17 = vld [vmem:[%s1414_s5 + $0x20] sm:$0xff]  ;;  %v312_v19 = vld [vmem:[%s1414_s5 + $0x48] sm:$0xff] }
  0x22   :  { %570 = vmatmul.mubr.msk.f32.vlgmr.msra.gmra.mrb[0].mxu0 %vm77_vm0, %v34_v18  ;;  %v667_v16 = vpack.c.bf16 %v310_v14, %v308_v13  ;;  %v309_v18 = vld [vmem:[%s1414_s5 + $0x30] sm:$0xff]  ;;  %664 = vmatprep.subr.bf16.mxu0 %v663_v11  ;;  %v314_v20 = vld [vmem:[%s1414_s5 + $0x58] sm:$0xff]  ;;  %v311_v23 = vld [vmem:[%s1414_s5 + $0x40] sm:$0xff] }
  0x23   :  { %630 = vmatpush1.bf16.msra.mxu1 %v629_v25  ;;  %666 = vmatpush1.bf16.msra.mxu0 %v665_v15  ;;  %v669_v21 = vpack.c.bf16 %v309_v18, %v307_v17  ;;  %v671_v22 = vpack.c.bf16 %v314_v20, %v312_v19  ;;  %v313_v24 = vld [vmem:[%s1414_s5 + $0x50] sm:$0xff]  ;;  %v316_v25 = vld [vmem:[%s1414_s5 + $0x68] sm:$0xff]  ;;  %v315_v29 = vld [vmem:[%s1414_s5 + $0x60] sm:$0xff] }
  0x24   :  { %632 = vmatprep.subr.bf16.mxu1 %v631_v26  ;;  %668 = vmatprep.subr.bf16.mxu0 %v667_v16  ;;  %v318_v26 = vld [vmem:[%s1414_s5 + $0x78] sm:$0xff]  ;;  %v673_v27 = vpack.c.bf16 %v313_v24, %v311_v23  ;;  %v317_v30 = vld [vmem:[%s1414_s5 + $0x70] sm:$0xff]  ;;  %v319_v35 = vld [vmem:[%s1414_s5 + $0x80] sm:$0xff] }
  0x25   :  { %v675_v28 = vpack.c.bf16 %v318_v26, %v316_v25  ;;  %v677_v33 = vpack.c.bf16 %v317_v30, %v315_v29  ;;  %v321_v36 = vld [vmem:[%s1414_s5 + $0x90] sm:$0xff]  ;;  %v323_v41 = vld [vmem:[%s1414_s5 + $0xa0] sm:$0xff]  ;;  %v344_v3 = vld [vmem:[%s1414_s5 + $0x148] sm:$0xff]  ;;  %v67_v25 = vlaneseq }
  0x26   :  { %v681_v39 = vpack.c.bf16 %v321_v36, %v319_v35  ;;  %v325_v42 = vld [vmem:[%s1414_s5 + $0xb0] sm:$0xff]  ;;  %v327_v47 = vld [vmem:[%s1414_s5 + $0xc0] sm:$0xff]  ;;  %v348_v9 = vld [vmem:[%s1414_s5 + $0x168] sm:$0xff] }
  0x27   :  { %634 = vmatpush1.bf16.msra.mxu1 %v633_v31  ;;  %670 = vmatpush1.bf16.msra.mxu0 %v669_v21  ;;  %v320_v31 = vld [vmem:[%s1414_s5 + $0x88] sm:$0xff]  ;;  %v685_v45 = vpack.c.bf16 %v325_v42, %v323_v41  ;;  %v329_v48 = vld [vmem:[%s1414_s5 + $0xd0] sm:$0xff]  ;;  %v331_v53 = vld [vmem:[%s1414_s5 + $0xe0] sm:$0xff]  ;;  %v68_v26 = vshrl.u32 %v67_v25, 7 }
  0x28   :  { %636 = vmatprep.subr.bf16.mxu1 %v635_v32  ;;  %672 = vmatprep.subr.bf16.mxu0 %v671_v22  ;;  %v322_v32 = vld [vmem:[%s1414_s5 + $0x98] sm:$0xff]  ;;  %v689_v51 = vpack.c.bf16 %v329_v48, %v327_v47  ;;  %v333_v54 = vld [vmem:[%s1414_s5 + $0xf0] sm:$0xff]  ;;  %v335_v59 = vld [vmem:[%s1414_s5 + $0x100] sm:$0xff]  ;;  %v773_v47 = vmov 0.0|0.0  }
  0x29   :  { %v679_v34 = vpack.c.bf16 %v322_v32, %v320_v31  ;;  %v693_v57 = vpack.c.bf16 %v333_v54, %v331_v53  ;;  %v337_v60 = vld [vmem:[%s1414_s5 + $0x110] sm:$0xff]  ;;  %v350_v10 = vld [vmem:[%s1414_s5 + $0x178] sm:$0xff]  ;;  %v347_v13 = vld [vmem:[%s1414_s5 + $0x160] sm:$0xff]  ;;  %v1265_v29 = vsub.s32 1, %v68_v26 }
  0x2a   :  { %v697_v63 = vpack.c.bf16 %v337_v60, %v335_v59  ;;  %v341_v2 = vld [vmem:[%s1414_s5 + $0x130] sm:$0xff]  ;;  %v707_v12 = vpack.c.bf16 %v350_v10, %v348_v9  ;;  %v352_v15 = vld [vmem:[%s1414_s5 + $0x188] sm:$0xff]  ;;  %v354_v16 = vld [vmem:[%s1414_s5 + $0x198] sm:$0xff] }
  0x2b   :  { %638 = vmatpush1.bf16.msra.mxu1 %v637_v37  ;;  %674 = vmatpush1.bf16.msra.mxu0 %v673_v27  ;;  %v324_v37 = vld [vmem:[%s1414_s5 + $0xa8] sm:$0xff]  ;;  %v345_v8 = vld [vmem:[%s1414_s5 + $0x150] sm:$0xff]  ;;  %v711_v18 = vpack.c.bf16 %v354_v16, %v352_v15  ;;  %v351_v19 = vld [vmem:[%s1414_s5 + $0x180] sm:$0xff]  ;;  %v1260_v27 = vsub.s32 0, %v68_v26 }
  0x2c   :  { %640 = vmatprep.subr.bf16.mxu1 %v639_v38  ;;  %676 = vmatprep.subr.bf16.mxu0 %v675_v28  ;;  %v326_v38 = vld [vmem:[%s1414_s5 + $0xb8] sm:$0xff]  ;;  %v349_v14 = vld [vmem:[%s1414_s5 + $0x170] sm:$0xff]  ;;  %v356_v21 = vld [vmem:[%s1414_s5 + $0x1a8] sm:$0xff] }
  0x2d   :  { %v683_v40 = vpack.c.bf16 %v326_v38, %v324_v37  ;;  %v709_v17 = vpack.c.bf16 %v349_v14, %v347_v13  ;;  %v353_v20 = vld [vmem:[%s1414_s5 + $0x190] sm:$0xff]  ;;  %v358_v22 = vld [vmem:[%s1414_s5 + $0x1b8] sm:$0xff]  ;;  %v65_v28 = vld [vmem:[%s1415_s2] sm:$0x3] }
  0x2e   :  { %v713_v23 = vpack.c.bf16 %v353_v20, %v351_v19  ;;  %v715_v24 = vpack.c.bf16 %v358_v22, %v356_v21  ;;  %v70_v30 = vrot.slane %v65_v28, %v1260_v27  ;;  %v74_v31 = vrot.slane %v65_v28, %v1265_v29  ;;  %v355_v38 = vld [vmem:[%s1414_s5 + $0x1a0] sm:$0xff]  ;;  %v360_v41 = vld [vmem:[%s1414_s5 + $0x1c8] sm:$0xff]  ;;  %v362_v42 = vld [vmem:[%s1414_s5 + $0x1d8] sm:$0xff] }
  0x2f   :  { %642 = vmatpush1.bf16.msra.mxu1 %v641_v43  ;;  %678 = vmatpush1.bf16.msra.mxu0 %v677_v33  ;;  %v328_v43 = vld [vmem:[%s1414_s5 + $0xc8] sm:$0xff]  ;;  %v451_v48 = vld [vmem:[%s1416_s7] sm:$0xff] }
  0x30   :  { %644 = vmatprep.subr.bf16.mxu1 %v643_v44  ;;  %680 = vmatprep.subr.bf16.mxu0 %v679_v34  ;;  %v330_v44 = vld [vmem:[%s1414_s5 + $0xd8] sm:$0xff]  ;;  %v455_v54 = vld [vmem:[%s1416_s7 + $0x20] sm:$0xff]  ;;  %v468_v9 = vld [vmem:[%s1416_s7 + $0x88] sm:$0xff] }
  0x31   :  { %v687_v46 = vpack.c.bf16 %v330_v44, %v328_v43  ;;  %v719_v43 = vpack.c.bf16 %v362_v42, %v360_v41  ;;  %v359_v44 = vld [vmem:[%s1414_s5 + $0x1c0] sm:$0xff]  ;;  %v472_v15 = vld [vmem:[%s1416_s7 + $0xa8] sm:$0xff]  ;;  %v14_v41 = vstv %s1418_s8 }
  0x32   :  { %v459_v60 = vld [vmem:[%s1416_s7 + $0x40] sm:$0xff]  ;;  %v476_v21 = vld [vmem:[%s1416_s7 + $0xc8] sm:$0xff]  ;;  %15 = vst [vmem:[#allocation2] sm:$0x1] %v14_v41 }
  0x33   :  { %646 = vmatpush1.bf16.msra.mxu1 %v645_v49  ;;  %682 = vmatpush1.bf16.msra.mxu0 %v681_v39  ;;  %v332_v49 = vld [vmem:[%s1414_s5 + $0xe8] sm:$0xff]  ;;  %v357_v39 = vld [vmem:[%s1414_s5 + $0x1b0] sm:$0xff]  ;;  %v471_v14 = vld [vmem:[%s1416_s7 + $0xa0] sm:$0xff] }
  0x34   :  { %648 = vmatprep.subr.bf16.mxu1 %v647_v50  ;;  %684 = vmatprep.subr.bf16.mxu0 %v683_v40  ;;  %v334_v50 = vld [vmem:[%s1414_s5 + $0xf8] sm:$0xff]  ;;  %v717_v40 = vpack.c.bf16 %v357_v39, %v355_v38  ;;  %v754_v16 = vpack.c.bf16 %v472_v15, %v471_v14  ;;  %v475_v20 = vld [vmem:[%s1416_s7 + $0xc0] sm:$0xff]  ;;  %v480_v38 = vld [vmem:[%s1416_s7 + $0xe8] sm:$0xff] }
  0x35   :  { %v691_v52 = vpack.c.bf16 %v334_v50, %v332_v49  ;;  %v452_v49 = vld [vmem:[%s1416_s7 + $0x8] sm:$0xff]  ;;  %v453_v50 = vld [vmem:[%s1416_s7 + $0x10] sm:$0xff]  ;;  %v760_v22 = vpack.c.bf16 %v476_v21, %v475_v20 }
  0x37   :  { %650 = vmatpush1.bf16.msra.mxu1 %v649_v55  ;;  %686 = vmatpush1.bf16.msra.mxu0 %v685_v45  ;;  %v336_v55 = vld [vmem:[%s1414_s5 + $0x108] sm:$0xff]  ;;  %v361_v45 = vld [vmem:[%s1414_s5 + $0x1d0] sm:$0xff] }
  0x38   :  { %652 = vmatprep.subr.bf16.mxu1 %v651_v56  ;;  %688 = vmatprep.subr.bf16.mxu0 %v687_v46  ;;  %v338_v56 = vld [vmem:[%s1414_s5 + $0x118] sm:$0xff]  ;;  %v721_v46 = vpack.c.bf16 %v361_v45, %v359_v44 }
  0x39   :  { %v695_v58 = vpack.c.bf16 %v338_v56, %v336_v55  ;;  %v456_v55 = vld [vmem:[%s1416_s7 + $0x28] sm:$0xff]  ;;  %v573_v42 = vld [vmem:[#allocation2] ss:$0 sm:$0xff] }
  0x3a   :  { %v730_v56 = vpack.c.bf16 %v456_v55, %v455_v54 }
  0x3b   :  { %654 = vmatpush1.bf16.msra.mxu1 %v653_v61  ;;  %690 = vmatpush1.bf16.msra.mxu0 %v689_v51  ;;  %v340_v61 = vld [vmem:[%s1414_s5 + $0x128] sm:$0xff]  ;;  %v724_v51 = vpack.c.bf16 %v452_v49, %v451_v48 }
  0x3c   :  { %656 = vmatprep.subr.bf16.mxu1 %v655_v62  ;;  %692 = vmatprep.subr.bf16.mxu0 %v691_v52  ;;  %v342_v62 = vld [vmem:[%s1414_s5 + $0x138] sm:$0xff] }
  0x3d   :  { %v699_v0 = vpack.c.bf16 %v342_v62, %v340_v61  ;;  %v454_v52 = vld [vmem:[%s1416_s7 + $0x18] sm:$0xff]  ;;  %v460_v61 = vld [vmem:[%s1416_s7 + $0x48] sm:$0xff] }
  0x3e   :  { %v727_v53 = vpack.c.bf16 %v454_v52, %v453_v50  ;;  %v736_v62 = vpack.c.bf16 %v460_v61, %v459_v60 }
  0x3f   :  { %658 = vmatpush1.bf16.msra.mxu1 %v657_v1  ;;  %694 = vmatpush1.bf16.msra.mxu0 %v693_v57  ;;  %v339_v1 = vld [vmem:[%s1414_s5 + $0x120] sm:$0xff]  ;;  %v457_v57 = vld [vmem:[%s1416_s7 + $0x30] sm:$0xff] }
  0x40   :  { %660 = vmatprep.subr.bf16.mxu1 %v659_v4  ;;  %696 = vmatprep.subr.bf16.mxu0 %v695_v58  ;;  %v346_v4 = vld [vmem:[%s1414_s5 + $0x158] sm:$0xff]  ;;  %v701_v5 = vpack.c.bf16 %v341_v2, %v339_v1  ;;  %v463_v2 = vld [vmem:[%s1416_s7 + $0x60] sm:$0xff] }
  0x41   :  { %v703_v6 = vpack.c.bf16 %v346_v4, %v344_v3  ;;  %v458_v58 = vld [vmem:[%s1416_s7 + $0x38] sm:$0xff]  ;;  %v464_v3 = vld [vmem:[%s1416_s7 + $0x68] sm:$0xff] }
  0x42   :  { %v733_v59 = vpack.c.bf16 %v458_v58, %v457_v57  ;;  %v742_v4 = vpack.c.bf16 %v464_v3, %v463_v2 }
  0x43   :  { %662 = vmatpush1.bf16.msra.mxu1 %v661_v7  ;;  %698 = vmatpush1.bf16.msra.mxu0 %v697_v63  ;;  %v343_v7 = vld [vmem:[%s1414_s5 + $0x140] sm:$0xff]  ;;  %v461_v63 = vld [vmem:[%s1416_s7 + $0x50] sm:$0xff] }
  0x44   :  { %700 = vmatprep.subr.bf16.mxu0 %v699_v0  ;;  %v705_v11 = vpack.c.bf16 %v345_v8, %v343_v7  ;;  %723 = vmatprep.subr.bf16.mxu1 %v773_v47  ;;  %v462_v0 = vld [vmem:[%s1416_s7 + $0x58] sm:$0xff]  ;;  %v467_v8 = vld [vmem:[%s1416_s7 + $0x80] sm:$0xff] }
  0x45   :  { %v739_v1 = vpack.c.bf16 %v462_v0, %v461_v63  ;;  %v748_v10 = vpack.c.bf16 %v468_v9, %v467_v8 }
  0x47   :  { %702 = vmatpush1.bf16.msra.mxu0 %v701_v5  ;;  %v465_v5 = vld [vmem:[%s1416_s7 + $0x70] sm:$0xff] }
  0x48   :  { %704 = vmatprep.subr.bf16.mxu0 %v703_v6  ;;  %v466_v6 = vld [vmem:[%s1416_s7 + $0x78] sm:$0xff] }
  0x49   :  { %v745_v7 = vpack.c.bf16 %v466_v6, %v465_v5 }
  0x4b   :  { %706 = vmatpush1.bf16.msra.mxu0 %v705_v11  ;;  %v469_v11 = vld [vmem:[%s1416_s7 + $0x90] sm:$0xff] }
  0x4c   :  { %708 = vmatprep.subr.bf16.mxu0 %v707_v12  ;;  %v470_v12 = vld [vmem:[%s1416_s7 + $0x98] sm:$0xff] }
  0x4d   :  { %v751_v13 = vpack.c.bf16 %v470_v12, %v469_v11 }
  0x4f   :  { %710 = vmatpush1.bf16.msra.mxu0 %v709_v17  ;;  %v473_v17 = vld [vmem:[%s1416_s7 + $0xb0] sm:$0xff] }
  0x50   :  { %712 = vmatprep.subr.bf16.mxu0 %v711_v18  ;;  %v474_v18 = vld [vmem:[%s1416_s7 + $0xb8] sm:$0xff] }
  0x51   :  { %v757_v19 = vpack.c.bf16 %v474_v18, %v473_v17 }
  0x53   :  { %714 = vmatpush1.bf16.msra.mxu0 %v713_v23  ;;  %v214_v23 = vld [vmem:[%s1417_s4] sm:$0x3] }
  0x54   :  { %716 = vmatprep.subr.bf16.mxu0 %v715_v24  ;;  %v219_v24 = vrot.slane %v214_v23, %v1260_v27  ;;  %v223_v25 = vrot.slane %v214_v23, %v1265_v29 }
  0x57   :  { %718 = vmatpush1.bf16.msra.mxu0 %v717_v40  ;;  %v774_v40 = vmov 0  }
  0x58   :  { %720 = vmatprep.subr.bf16.mxu0 %v719_v43  ;;  %771 = vset.pattern.permute.xlu0 %v774_v40  ;;  %v363_v43 = vld [vmem:[%s1419_s6] sm:$0x3] }
  0x59   :  { %488 = vperm.xlu0 %771, %v573_v42   ;;  %v368_v44 = vrot.slane %v363_v43, %v1260_v27  ;;  %v372_v45 = vrot.slane %v363_v43, %v1265_v29 }
  0x5b   :  { %722 = vmatpush1.bf16.msra.mxu0 %v721_v46 }
  0xd8   :  { %v489_v52 = vpop.permute.xlu0 %488 }
  0xf5   :  { %v147_v32 = vpop.f32.mrb[0].mxu0 }
  0xf6   :  { %v148_v33 = vadd.f32 %v147_v32, %v70_v30  ;;  %v149_v34 = vpop.f32.mrb[1].mxu0 }
  0xf7   :  { %v150_v35 = vadd.f32 %v149_v34, %v74_v31  ;;  %v477_v34 = vld [vmem:[%s1416_s7 + $0xd0] sm:$0xff] }
  0xf8   :  { %v152_v37 = vmax.f32 %v148_v33, 0.0 }
  0xf9   :  { %v153_v36 = vmax.f32 %v150_v35, 0.0  ;;  %v478_v35 = vld [vmem:[%s1416_s7 + $0xd8] sm:$0xff] }
  0xfb   :  { %571 = vmatprep.mubr.msk.f32.mxu1 %vm226_vm1, %v153_v36  ;;  %v763_v36 = vpack.c.bf16 %v478_v35, %v477_v34 }
  0xfc   :  { %295 = vmatmul.mubr.f32.vlgmr.msra.gmra.mrb[0].mxu1 %v152_v37  ;;  %v479_v37 = vld [vmem:[%s1416_s7 + $0xe0] sm:$0xff] }
  0xfd   :  { %725 = vmatpush1.bf16.msra.mxu1 %v724_v51  ;;  %v766_v39 = vpack.c.bf16 %v480_v38, %v479_v37 }
  0xfe   :  { %726 = vmatprep.subr.bf16.mxu1 %v773_v47 }
 0x101   :  { %728 = vmatpush1.bf16.msra.mxu1 %v727_v53 }
 0x102   :  { %729 = vmatprep.subr.bf16.mxu1 %v773_v47 }
 0x105   :  { %731 = vmatpush1.bf16.msra.mxu1 %v730_v56 }
 0x106   :  { %732 = vmatprep.subr.bf16.mxu1 %v773_v47 }
 0x109   :  { %734 = vmatpush1.bf16.msra.mxu1 %v733_v59 }
 0x10a   :  { %735 = vmatprep.subr.bf16.mxu1 %v773_v47 }
 0x10d   :  { %737 = vmatpush1.bf16.msra.mxu1 %v736_v62 }
 0x10e   :  { %738 = vmatprep.subr.bf16.mxu1 %v773_v47 }
 0x111   :  { %740 = vmatpush1.bf16.msra.mxu1 %v739_v1 }
 0x112   :  { %741 = vmatprep.subr.bf16.mxu1 %v773_v47 }
 0x115   :  { %743 = vmatpush1.bf16.msra.mxu1 %v742_v4 }
 0x116   :  { %744 = vmatprep.subr.bf16.mxu1 %v773_v47 }
 0x119   :  { %746 = vmatpush1.bf16.msra.mxu1 %v745_v7 }
 0x11a   :  { %747 = vmatprep.subr.bf16.mxu1 %v773_v47 }
 0x11d   :  { %749 = vmatpush1.bf16.msra.mxu1 %v748_v10 }
 0x11e   :  { %750 = vmatprep.subr.bf16.mxu1 %v773_v47 }
 0x121   :  { %752 = vmatpush1.bf16.msra.mxu1 %v751_v13 }
 0x122   :  { %753 = vmatprep.subr.bf16.mxu1 %v773_v47 }
 0x125   :  { %755 = vmatpush1.bf16.msra.mxu1 %v754_v16 }
 0x126   :  { %756 = vmatprep.subr.bf16.mxu1 %v773_v47 }
 0x129   :  { %758 = vmatpush1.bf16.msra.mxu1 %v757_v19 }
 0x12a   :  { %759 = vmatprep.subr.bf16.mxu1 %v773_v47 }
 0x12d   :  { %761 = vmatpush1.bf16.msra.mxu1 %v760_v22 }
 0x12e   :  { %762 = vmatprep.subr.bf16.mxu1 %v773_v47 }
 0x131   :  { %764 = vmatpush1.bf16.msra.mxu1 %v763_v36 }
 0x132   :  { %765 = vmatprep.subr.bf16.mxu1 %v773_v47 }
 0x135   :  { %767 = vmatpush1.bf16.msra.mxu1 %v766_v39 }
 0x1cf   :  { %v296_v26 = vpop.f32.mrb[0].mxu1 }
 0x1d0   :  { %v297_v28 = vadd.f32 %v296_v26, %v219_v24  ;;  %v298_v30 = vpop.f32.mrb[1].mxu1 }
 0x1d1   :  { %v299_v31 = vadd.f32 %v298_v30, %v223_v25 }
 0x1d2   :  { %v301_v33 = vmax.f32 %v297_v28, 0.0 }
 0x1d3   :  { %v302_v32 = vmax.f32 %v299_v31, 0.0 }
 0x1d5   :  { %572 = vmatprep.mubr.msk.f32.mxu0 %vm226_vm1, %v302_v32 }
 0x1d6   :  { %443 = vmatmul.mubr.f32.vlgmr.msra.gmra.mrb[2].mxu0 %v301_v33 }
 0x2a9   :  { %v444_v46 = vpop.f32.mrb[2].mxu0 }
 0x2aa   :  { %v445_v47 = vadd.f32 %v444_v46, %v368_v44  ;;  %v446_v48 = vpop.f32.mrb[3].mxu0 }
 0x2ab   :  { %v447_v49 = vadd.f32 %v446_v48, %v372_v45 }
 0x2ac   :  { %v449_v51 = vmax.f32 %v445_v47, 0.0 }
 0x2ad   :  { %v450_v50 = vmax.f32 %v447_v49, 0.0 }
 0x2af   :  { %574 = vmatprep.mubr.msk.f32.mxu1 %vm226_vm1, %v450_v50 }
 0x2b0   :  { %559 = vmatmul.mubr.f32.vlgmr.msra.gmra.mrb[2].mxu1 %v449_v51 }
 0x383   :  { %v560_v53 = vpop.f32.mrb[2].mxu1 }
 0x384   :  { %v561_v54 = vadd.f32 %v560_v53, %v489_v52  ;;  %v562_v55 = vpop.f32.mrb[3].mxu1 }
 0x386   :  { %565 = vst.msk [vmem:[%s1420_s9] sm:$0xff] %vm564_vm2, %v561_v54 }

</bundles_post_ra>
